<compile_context>
chip_gen: v6e
topology: v6e:2x2x1
jax: 0.10.0
libtpu: 0.0.40
codegen_flags: <defaults>
</compile_context>

<pallas_src>
import jax
import jax.numpy as jnp
from jax.experimental import pallas as pl
from jax.experimental.pallas import tpu as pltpu

GAMMA = 2.0        # sigmoid**2 rewrite assumes gamma == 2 (asserted in wrapper)
LANE = 128
SUBLANE = 8
TB_TARGET = 512    # rows per tile    (multiple of 8)
TN_TARGET = 1024   # columns per tile (multiple of 128)


def _round_up(x, m):
    return ((x + m - 1) // m) * m


def _make_kernel(B, N, TB, TN):
    """Kernel closure over the static problem/tile sizes."""

    def kernel(x_ref, t_ref, w_ref, o_ref, acc_ref):
        i = pl.program_id(0)   # row-tile index    (parallel)
        j = pl.program_id(1)   # column-tile index (reduction, innermost)

        @pl.when(j == 0)
        def _init():
            acc_ref[...] = jnp.zeros_like(acc_ref)

        x = x_ref[...].astype(jnp.float32)   # (TB, TN) logits
        t = t_ref[...].astype(jnp.float32)   # (TB, TN) labels (cols >= N hold the
                                             #   weight column / garbage -> masked)

        # Ragged-edge mask: replaces wrapper-side padding.  Out-of-bounds block
        # regions hold unspecified data, so always select with where.
        row_ids = jax.lax.broadcasted_iota(jnp.int32, (TB, TN), 0) + i * TB
        col_ids = jax.lax.broadcasted_iota(jnp.int32, (TB, TN), 1) + j * TN
        valid = jnp.logical_and(row_ids < B, col_ids < N)
        row_valid = row_ids[:, :1] < B                      # (TB, 1)

        # log_sigmoid(x)  = -(max(-x,0) + log(1+exp(-|x|)));  max(-x,0) = m - x
        # log_sigmoid(-x) = -(max( x,0) + log(1+exp(-|x|)))
        # exp(2*log_sigmoid(+-x)) = sigmoid(+-x)^2            (gamma == 2)
        m = jnp.maximum(x, 0.0)
        e = jnp.exp(-jnp.abs(x))             # 1 EUP op / element
        lp = jnp.log(1.0 + e)                # 1 EUP op / element
        ls_pos = (x - m) - lp                # log_sigmoid(x)
        ls_neg = -(m + lp)                   # log_sigmoid(-x)

        d = 1.0 + e
        r = pl.reciprocal(d, approx=True)    # EUP vrcp, ~2^-12 rel error
        r = r * (2.0 - d * r)                # one Newton step -> ~f32 exact
        er = e * r                           # e/(1+e) = sigmoid(-|x|)
        sig_p = jnp.where(x >= 0.0, r, er)   # sigmoid(x)
        sig_m = jnp.where(x >= 0.0, er, r)   # sigmoid(-x)

        loss = -(t * ls_pos * (sig_m * sig_m)
                 + (1.0 - t) * ls_neg * (sig_p * sig_p))
        loss = jnp.where(valid, loss, 0.0)

        # Per-row partial sum over this column tile (lane reduce, XLU slot).
        acc_ref[...] += jnp.sum(loss, axis=-1, keepdims=True)

        @pl.when(j == pl.num_programs(1) - 1)
        def _finalize():
            w = jnp.where(row_valid, w_ref[...].astype(jnp.float32), 0.0)
            o_ref[...] = acc_ref[...] * w    # weighted per-row sums; rows >= B are 0

    return kernel


def focal_loss_with_weight(input_, target, gamma=2.0, reduction="mean"):
    """input_: (B, N) logits; target: (B, N+1) with per-row weight in the last column."""
    assert gamma == GAMMA, "gamma==2 is baked into the kernel (sigmoid**2 rewrite)"
    if reduction != "mean":
        # TODO(synk): reduction != 'mean' (elementwise wloss return) path not implemented.
        raise NotImplementedError("only reduction='mean' is implemented")

    B, N = input_.shape
    assert target.shape == (B, N + 1)

    # Tiny (B, 1) weight column; the (B, N) label block is read directly out of
    # `target` inside the kernel (no materialized slice / pad of the big array).
    weights = target[:, N:N + 1]

    # Balanced cdiv tiling over the real extents.  No padded HBM traffic; the
    # masked tail of the last row/column tile is only a little wasted compute.
    n128 = _round_up(max(N, 1), LANE)
    col_tiles = int(pl.cdiv(n128, TN_TARGET))
    TN = _round_up(int(pl.cdiv(n128, col_tiles)), LANE)
    b8 = _round_up(max(B, 1), SUBLANE)
    row_tiles = int(pl.cdiv(b8, TB_TARGET))
    TB = _round_up(int(pl.cdiv(b8, row_tiles)), SUBLANE)

    kernel = _make_kernel(B, N, TB, TN)

    elems = row_tiles * TB * col_tiles * TN
    cost = pl.CostEstimate(
        flops=18 * elems,
        transcendentals=3 * elems,
        bytes_accessed=int(input_.size * input_.dtype.itemsize
                           + target.size * target.dtype.itemsize
                           + weights.size * weights.dtype.itemsize
                           + row_tiles * TB * 4),
    )

    grid_spec = pltpu.PrefetchScalarGridSpec(
        num_scalar_prefetch=0,
        grid=(row_tiles, col_tiles),
        in_specs=[
            pl.BlockSpec((TB, TN), lambda i, j: (i, j)),   # input_  (B, N)
            pl.BlockSpec((TB, TN), lambda i, j: (i, j)),   # target  (B, N+1), labels in place
            pl.BlockSpec((TB, 1), lambda i, j: (i, 0)),    # weights (B, 1)
        ],
        out_specs=pl.BlockSpec((TB, 1), lambda i, j: (i, 0)),
        scratch_shapes=[pltpu.VMEM((TB, 1), jnp.float32)],
    )

    row_sums = pl.pallas_call(
        kernel,
        out_shape=jax.ShapeDtypeStruct((row_tiles * TB, 1), jnp.float32),
        grid_spec=grid_spec,
        compiler_params=pltpu.CompilerParams(
            dimension_semantics=("parallel", "arbitrary"),
            vmem_limit_bytes=32 * 1024 * 1024,
        ),
        cost_estimate=cost,
    )(input_, target, weights)

    total = jnp.sum(row_sums)   # rows >= B were zeroed in-kernel
    # n * mean over all B*N real elements.
    return jnp.float32(N) * (total / jnp.float32(B * N))


def _reference(input_, target, gamma=2.0):
    n = input_.shape[-1]
    weights = jnp.broadcast_to(target[:, -1:], target[:, :-1].shape).reshape(-1)
    tgt = target[:, :-1].reshape(-1).astype(jnp.float32)
    x = input_.reshape(-1).astype(jnp.float32)
    ls_p = jax.nn.log_sigmoid(x)
    ls_n = jax.nn.log_sigmoid(-x)
    loss = -tgt * ls_p * jnp.exp(gamma * ls_n) - (1.0 - tgt) * ls_n * jnp.exp(gamma * ls_p)
    return n * jnp.mean(loss * weights.astype(jnp.float32))


if __name__ == "__main__":
    key = jax.random.PRNGKey(0)
    # One aligned shape and one deliberately ragged shape (not multiples of
    # 8 / 128) to exercise the in-kernel edge masking.
    for (B, N) in [(8, 16), (10, 200)]:
        key, k1, k2, k3 = jax.random.split(key, 4)
        x = jax.random.normal(k1, (B, N), dtype=jnp.float32) * 2.0           # logits
        labels = (jax.random.uniform(k2, (B, N)) > 0.5).astype(jnp.float32)  # 0/1 targets
        w = jax.random.uniform(k3, (B, 1), minval=0.5, maxval=1.5)           # per-row weight
        target = jnp.concatenate([labels, w], axis=-1)                       # (B, N+1)

        out = jax.block_until_ready(focal_loss_with_weight(x, target))
        ref = jax.block_until_ready(_reference(x, target))
        assert jnp.allclose(out, ref, rtol=1e-5, atol=1e-5), (B, N, out, ref)

    print("KERNEL_OK")
</pallas_src>

<mosaic_0001>
module attributes {stable_mosaic.version = 11 : i64} {
  func.func @kernel(%arg0: i32, %arg1: i32, %arg2: memref<8x128xf32, #tpu.memory_space<vmem>>, %arg3: memref<8x128xf32, #tpu.memory_space<vmem>>, %arg4: memref<8x1xf32, #tpu.memory_space<vmem>>, %arg5: memref<8x1xf32, #tpu.memory_space<vmem>>, %arg6: memref<8x1xf32, #tpu.memory_space<vmem>>) attributes {dimension_semantics = [#tpu.dimension_semantics<parallel>, #tpu.dimension_semantics<arbitrary>], iteration_bounds = array<i64: 1, 1>, scalar_prefetch = 0 : i64, scratch_operands = 1 : i64, tpu.core_type = #tpu.core_type<tc>, window_params = [{transform_indices = @transform_0, window_bounds = array<i64: 8, 128>}, {transform_indices = @transform_1, window_bounds = array<i64: 8, 128>}, {transform_indices = @transform_2, window_bounds = array<i64: 8, 1>}, {transform_indices = @transform_3, window_bounds = array<i64: 8, 1>}]} {
    %c0_i32 = arith.constant 0 : i32
    %0 = arith.cmpi eq, %arg1, %c0_i32 : i32
    %1 = arith.extui %0 : i1 to i32
    %c0_i32_0 = arith.constant 0 : i32
    %2 = arith.cmpi ne, %1, %c0_i32_0 : i32
    scf.if %2 {
      %cst_23 = arith.constant 0.000000e+00 : f32
      %70 = vector.broadcast %cst_23 : f32 to vector<8x1xf32>
      %c0_24 = arith.constant 0 : index
      %c0_25 = arith.constant 0 : index
      %71 = vector.load %arg6[%c0_24, %c0_25] : memref<8x1xf32, #tpu.memory_space<vmem>>, vector<8x1xf32>
      tpu.vector_store %arg6[%c0_24, %c0_25], %70 {strides = array<i32>} : memref<8x1xf32, #tpu.memory_space<vmem>>, vector<8x1xf32>,
    } else {
    }
    %c0 = arith.constant 0 : index
    %c0_1 = arith.constant 0 : index
    %3 = vector.load %arg2[%c0, %c0_1] : memref<8x128xf32, #tpu.memory_space<vmem>>, vector<8x128xf32>
    %c0_2 = arith.constant 0 : index
    %c0_3 = arith.constant 0 : index
    %4 = vector.load %arg3[%c0_2, %c0_3] : memref<8x128xf32, #tpu.memory_space<vmem>>, vector<8x128xf32>
    %5 = tpu.iota {dimensions = array<i32: 0>} : vector<8x128xi32>
    %c8_i32 = arith.constant 8 : i32
    %6 = arith.muli %arg0, %c8_i32 : i32
    %7 = vector.broadcast %6 : i32 to vector<8x128xi32>
    %8 = arith.addi %5, %7 : vector<8x128xi32>
    %9 = tpu.iota {dimensions = array<i32: 1>} : vector<8x128xi32>
    %c128_i32 = arith.constant 128 : i32
    %10 = arith.muli %arg1, %c128_i32 : i32
    %11 = vector.broadcast %10 : i32 to vector<8x128xi32>
    %12 = arith.addi %9, %11 : vector<8x128xi32>
    %c8_i32_4 = arith.constant 8 : i32
    %13 = vector.broadcast %c8_i32_4 : i32 to vector<8x128xi32>
    %14 = arith.cmpi slt, %8, %13 : vector<8x128xi32>
    %c16_i32 = arith.constant 16 : i32
    %15 = vector.broadcast %c16_i32 : i32 to vector<8x128xi32>
    %16 = arith.cmpi slt, %12, %15 : vector<8x128xi32>
    %17 = arith.andi %14, %16 : vector<8x128xi1>
    %18 = vector.extract_strided_slice %8 {offsets = [0, 0], sizes = [8, 1], strides = [1, 1]} : vector<8x128xi32> to vector<8x1xi32>
    %c8_i32_5 = arith.constant 8 : i32
    %19 = vector.broadcast %c8_i32_5 : i32 to vector<8x1xi32>
    %20 = arith.cmpi slt, %18, %19 : vector<8x1xi32>
    %cst = arith.constant 0.000000e+00 : f32
    %21 = vector.broadcast %cst : f32 to vector<8x128xf32>
    %22 = arith.maximumf %3, %21 : vector<8x128xf32>
    %23 = math.absf %3 : vector<8x128xf32>
    %cst_6 = arith.constant 0.000000e+00 : f32
    %24 = vector.broadcast %cst_6 : f32 to vector<8x128xf32>
    %25 = arith.subf %24, %23 : vector<8x128xf32>
    %26 = math.exp %25 : vector<8x128xf32>
    %cst_7 = arith.constant 1.000000e+00 : f32
    %27 = vector.broadcast %cst_7 : f32 to vector<8x128xf32>
    %28 = arith.addf %27, %26 : vector<8x128xf32>
    %29 = math.log %28 : vector<8x128xf32>
    %30 = arith.subf %3, %22 : vector<8x128xf32>
    %31 = arith.subf %30, %29 : vector<8x128xf32>
    %32 = arith.addf %22, %29 : vector<8x128xf32>
    %cst_8 = arith.constant 0.000000e+00 : f32
    %33 = vector.broadcast %cst_8 : f32 to vector<8x128xf32>
    %34 = arith.subf %33, %32 : vector<8x128xf32>
    %cst_9 = arith.constant 1.000000e+00 : f32
    %35 = vector.broadcast %cst_9 : f32 to vector<8x128xf32>
    %36 = arith.addf %35, %26 : vector<8x128xf32>
    %37 = tpu.reciprocal %36 {approx = true} : vector<8x128xf32> -> vector<8x128xf32>
    %38 = arith.mulf %36, %37 : vector<8x128xf32>
    %cst_10 = arith.constant 2.000000e+00 : f32
    %39 = vector.broadcast %cst_10 : f32 to vector<8x128xf32>
    %40 = arith.subf %39, %38 : vector<8x128xf32>
    %41 = arith.mulf %37, %40 : vector<8x128xf32>
    %42 = arith.mulf %26, %41 : vector<8x128xf32>
    %cst_11 = arith.constant 0.000000e+00 : f32
    %43 = vector.broadcast %cst_11 : f32 to vector<8x128xf32>
    %44 = arith.cmpf oge, %3, %43 : vector<8x128xf32>
    %45 = arith.select %44, %41, %42 : vector<8x128xi1>, vector<8x128xf32>
    %cst_12 = arith.constant 0.000000e+00 : f32
    %46 = vector.broadcast %cst_12 : f32 to vector<8x128xf32>
    %47 = arith.cmpf oge, %3, %46 : vector<8x128xf32>
    %48 = arith.select %47, %42, %41 : vector<8x128xi1>, vector<8x128xf32>
    %49 = arith.mulf %4, %31 : vector<8x128xf32>
    %50 = arith.mulf %48, %48 : vector<8x128xf32>
    %51 = arith.mulf %49, %50 : vector<8x128xf32>
    %cst_13 = arith.constant 1.000000e+00 : f32
    %52 = vector.broadcast %cst_13 : f32 to vector<8x128xf32>
    %53 = arith.subf %52, %4 : vector<8x128xf32>
    %54 = arith.mulf %53, %34 : vector<8x128xf32>
    %55 = arith.mulf %45, %45 : vector<8x128xf32>
    %56 = arith.mulf %54, %55 : vector<8x128xf32>
    %57 = arith.addf %51, %56 : vector<8x128xf32>
    %cst_14 = arith.constant 0.000000e+00 : f32
    %58 = vector.broadcast %cst_14 : f32 to vector<8x128xf32>
    %59 = arith.subf %58, %57 : vector<8x128xf32>
    %cst_15 = arith.constant 0.000000e+00 : f32
    %60 = vector.broadcast %cst_15 : f32 to vector<8x128xf32>
    %61 = arith.select %17, %59, %60 : vector<8x128xi1>, vector<8x128xf32>
    %c0_16 = arith.constant 0 : index
    %c0_17 = arith.constant 0 : index
    %62 = vector.load %arg6[%c0_16, %c0_17] : memref<8x1xf32, #tpu.memory_space<vmem>>, vector<8x1xf32>
    %cst_18 = arith.constant dense<0.000000e+00> : vector<8xf32>
    %63 = vector.multi_reduction <add>, %61, %cst_18 [1] : vector<8x128xf32> to vector<8xf32>
    %64 = vector.shape_cast %63 : vector<8xf32> to vector<8x1xf32>
    %65 = arith.addf %62, %64 : vector<8x1xf32>
    %c0_19 = arith.constant 0 : index
    %c0_20 = arith.constant 0 : index
    %66 = vector.load %arg6[%c0_19, %c0_20] : memref<8x1xf32, #tpu.memory_space<vmem>>, vector<8x1xf32>
    tpu.vector_store %arg6[%c0_19, %c0_20], %65 {strides = array<i32>} : memref<8x1xf32, #tpu.memory_space<vmem>>, vector<8x1xf32>,
    %c0_i32_21 = arith.constant 0 : i32
    %67 = arith.cmpi eq, %arg1, %c0_i32_21 : i32
    %68 = arith.extui %67 : i1 to i32
    %c0_i32_22 = arith.constant 0 : i32
    %69 = arith.cmpi ne, %68, %c0_i32_22 : i32
    scf.if %69 {
      %c0_23 = arith.constant 0 : index
      %c0_24 = arith.constant 0 : index
      %70 = vector.load %arg4[%c0_23, %c0_24] : memref<8x1xf32, #tpu.memory_space<vmem>>, vector<8x1xf32>
      %cst_25 = arith.constant 0.000000e+00 : f32
      %71 = vector.broadcast %cst_25 : f32 to vector<8x1xf32>
      %72 = arith.select %20, %70, %71 : vector<8x1xi1>, vector<8x1xf32>
      %c0_26 = arith.constant 0 : index
      %c0_27 = arith.constant 0 : index
      %73 = vector.load %arg6[%c0_26, %c0_27] : memref<8x1xf32, #tpu.memory_space<vmem>>, vector<8x1xf32>
      %74 = arith.mulf %73, %72 : vector<8x1xf32>
      %c0_28 = arith.constant 0 : index
      %c0_29 = arith.constant 0 : index
      %75 = vector.load %arg5[%c0_28, %c0_29] : memref<8x1xf32, #tpu.memory_space<vmem>>, vector<8x1xf32>
      tpu.vector_store %arg5[%c0_28, %c0_29], %74 {strides = array<i32>} : memref<8x1xf32, #tpu.memory_space<vmem>>, vector<8x1xf32>,
    } else {
    }
    return
  }
  func.func @transform_0(%arg0: i32, %arg1: i32) -> (i32, i32) {
    %c0_i32 = arith.constant 0 : i32
    return %arg0, %arg1 : i32, i32
  }
  func.func @transform_1(%arg0: i32, %arg1: i32) -> (i32, i32) {
    %c0_i32 = arith.constant 0 : i32
    return %arg0, %arg1 : i32, i32
  }
  func.func @transform_2(%arg0: i32, %arg1: i32) -> (i32, i32) {
    %c0_i32 = arith.constant 0 : i32
    %c0_i32_0 = arith.constant 0 : i32
    return %arg0, %c0_i32 : i32, i32
  }
  func.func @transform_3(%arg0: i32, %arg1: i32) -> (i32, i32) {
    %c0_i32 = arith.constant 0 : i32
    %c0_i32_0 = arith.constant 0 : i32
    return %arg0, %c0_i32 : i32, i32
  }
}

</mosaic_0001>

<bundles_post_ra>
// kernel: tpu_custom_call.1
= control target key start
LH: loop header
LB: loop body
LE: loop exit
PB: predicated region body
PF: predicated region fallthrough
CT: control target
= control target key end

     0   :  { %8 = vsyncpa [#allocation4], 0  ;;  %s126_s12 = smov [#allocation3]   ;;  %s163_s0 = inlined_call_operand.vmem [shape: f32[8,16], index: 0, kind: input, shape index: {}]   ;;  %s164_s1 = inlined_call_operand.hbm [shape: f32[8,17], index: 1, kind: input, shape index: {}]   ;;  %s165_s2 = inlined_call_operand.vmem [shape: f32[8,1], index: 2, kind: input, shape index: {}]   ;;  %s166_s3 = inlined_call_operand.vmem [shape: f32[8,1], index: 3, kind: output, shape index: {}]  }
   0x1   :  { %s17_s13 = sshll.u32 %s126_s12, 4  ;;  %s18_s13 = int_to_ptr.vmem [resolvable:$true] %s17_s13 }
   0x2   :  { %s112_s14 = scalar_lea.vmem %s18_s13, 128  ;;  %p117_p1 = scmp.lt.s32.totalorder %s18_s13, %s18_s13 }
   0x3   :  { %p113_p0 = scmp.ne.s32.totalorder %s18_s13, %s112_s14  ;;  %p118_p2 = scmp.lt.s32.totalorder %s112_s14, %s112_s14 }
   0x5   :  { %p119_p3 = por %p118_p2, %p117_p1 }
   0x7   :  { %p120_p4 = pnand %p119_p3, %p113_p0 }
   0x9   :  { %123 = shalt.err (!%p120_p4)
}
   0xa   :  { %20 = dma.hbm_to_vmem [thread:$0]  %s164_s1, 128, %s18_s13, [#allocation4]  }
   0xb   :  { %124 = dma.done.wait [#allocation4], 128  }
   0xc   :  { %125 = vsyncadd [#allocation4], 4294967168  ;;  %vm30_vm0 = vcmask 7168   ;;  %v127_v0 = vmov 0.0   ;;  %v32_v1 = vld [vmem:[%s163_s0] sm:$0xff]  ;;  %v33_v12 = vld [vmem:[#allocation3] sm:$0xff]  ;;  %v39_v20 = vlaneseq }
   0xd   :  { %31 = vst.msk [vmem:[#allocation2] sm:$0xff] %vm30_vm0, %v127_v0  ;;  %v48_v2 = vand.u32 2147483647, %v32_v1  ;;  %v47_v7 = vmax.f32 %v32_v1, 0.0  ;;  %v70_v18 = vsub.f32 1.0, %v33_v12  ;;  %vm64_vm1 = vcmp.ge.f32.partialorder %v32_v1, 0.0 }
   0xe   :  { %v40_v28 = vand.u32 127, %v39_v20  ;;  %v86_v37 = vld [vmem:[%s165_s2] sm:$0xff] }
   0xf   :  { %v49_v3 = vsub.f32 0.0, %v48_v2  ;;  %v55_v11 = vsub.f32 %v32_v1, %v47_v7 }
  0x10   :  { %vm45_vm2 = vcmp.lt.s32.totalorder %v40_v28, 16 }
  0x11   :  { %v50_v4 = vmul.f32 1.442695, %v49_v3 }
  0x13   :  { %98 = vpow2.f32 %v50_v4 }
  0x14   :  { %v77_v34 = vld [vmem:[#allocation2] sm:$0xff] }
  0x20   :  { %v99_v5 = vpop.eup %98 }
  0x21   :  { %v52_v6 = vadd.f32 1.0, %v99_v5 }
  0x23   :  { %100 = vlog2.f32 %v52_v6 }
  0x24   :  { %102 = vrcp.f32 %v52_v6 }
  0x30   :  { %v101_v8 = vpop.eup %100 }
  0x31   :  { %v103_v9 = vpop.eup %102  ;;  %v54_v10 = vmul.f32 0.6931472, %v101_v8 }
  0x32   :  { %v60_v13 = vmul.f32 %v103_v9, %v52_v6 }
  0x33   :  { %v57_v14 = vadd.f32 %v54_v10, %v47_v7  ;;  %v56_v16 = vsub.f32 %v55_v11, %v54_v10 }
  0x34   :  { %v61_v15 = vsub.f32 2.0, %v60_v13 }
  0x35   :  { %v58_v17 = vsub.f32 0.0, %v57_v14  ;;  %v67_v22 = vmul.f32 %v56_v16, %v33_v12 }
  0x36   :  { %v62_v19 = vmul.f32 %v103_v9, %v61_v15 }
  0x37   :  { %v71_v23 = vmul.f32 %v70_v18, %v58_v17 }
  0x38   :  { %v63_v21 = vmul.f32 %v99_v5, %v62_v19 }
  0x3a   :  { %v65_v24 = vsel %vm64_vm1, %v62_v19, %v63_v21  ;;  %v66_v25 = vsel %vm64_vm1, %v63_v21, %v62_v19 }
  0x3b   :  { %v68_v26 = vmul.f32 %v66_v25, %v66_v25  ;;  %v72_v27 = vmul.f32 %v65_v24, %v65_v24 }
  0x3d   :  { %v69_v29 = vmul.f32 %v68_v26, %v67_v22  ;;  %v73_v30 = vmul.f32 %v72_v27, %v71_v23 }
  0x3f   :  { %v74_v31 = vadd.f32 %v73_v30, %v69_v29 }
  0x41   :  { %v75_v32 = vsub.f32 0.0, %v74_v31 }
  0x43   :  { %v76_v33 = vsel %vm45_vm2, %v75_v32, 0.0 }
  0x44   :  { %78 = vadd.xlane.f32.xlu0 %v76_v33 }
  0xcd   :  { %v79_v35 = vpop.xlane.xlu0 %78 }
  0xce   :  { %v80_v36 = vadd.f32 %v79_v35, %v77_v34 }
  0xd0   :  { %82 = vst.msk [vmem:[#allocation2] sm:$0xff] %vm30_vm0, %v80_v36 }
  0xd7   :  { %v88_v38 = vld [vmem:[#allocation2] sm:$0xff] }
  0xd8   :  { %v89_v39 = vmul.f32 %v88_v38, %v86_v37 }
  0xda   :  { %90 = vst.msk [vmem:[%s166_s3] sm:$0xff] %vm30_vm0, %v89_v39 }
  0xdb   :  { %95 = vsyncpa [#allocation4], 1 }

</bundles_post_ra>
